<compile_context>
chip_gen: v7x
topology: tpu7x:2x2x1
jax: 0.10.0
libtpu: 0.0.40
codegen_flags: <defaults>
</compile_context>

<pallas_src>
import jax
import jax.numpy as jnp
from jax.experimental import pallas as pl
from jax.experimental.pallas import tpu as pltpu


# ---------------------------------------------------------------------------
# Kernel body
# ---------------------------------------------------------------------------
def _fused_router_kernel(x_ref, w1_ref, w2_ref, bias_ref, out_ref):
    # fc1: [tb, E] @ [E, D] -> [tb, D]; bf16 operands, f32 accumulate (MXU).
    h = jnp.dot(x_ref[...], w1_ref[...], preferred_element_type=jnp.float32)

    # LayerNorm over the last dim (eps = 1e-5), f32 math.  Two-pass (centered)
    # variance: same reduction count as the single-pass form (the centered `c`
    # is needed for the normalization anyway) but numerically robust.
    # Affine (gamma/beta) is folded into w2_ref / bias_ref offline.
    mean = jnp.mean(h, axis=-1, keepdims=True)
    c = h - mean
    var = jnp.mean(c * c, axis=-1, keepdims=True)
    hn = (c * jax.lax.rsqrt(var + 1e-5)).astype(x_ref.dtype)

    # fc2 (neurons + heads + lane padding) as ONE wide matmul, plus the folded
    # LayerNorm-beta bias row.  Output store is lane-dense (padded width).
    out = jnp.dot(hn, w2_ref[...], preferred_element_type=jnp.float32)
    out_ref[...] = (out + bias_ref[...]).astype(out_ref.dtype)


# ---------------------------------------------------------------------------
# Generation-aware sizing helpers
# ---------------------------------------------------------------------------
def _round_up(x, m):
    return ((x + m - 1) // m) * m


def _vmem_capacity_bytes():
    """Physical VMEM per TensorCore for the current chip."""
    try:
        return int(pltpu.get_tpu_info().vmem_capacity_bytes)
    except Exception:
        pass
    try:
        kind = jax.devices()[0].device_kind.lower()
        if "v7" in kind:
            return 64 << 20          # v7x: 64 MiB per TensorCore
    except Exception:
        pass
    return 128 << 20                 # v5e / v6e: 128 MiB


def _default_lane_pad():
    """MXU-native output-lane padding: 128 on <=v5, 256 on v6e/v7x."""
    try:
        kind = jax.devices()[0].device_kind.lower()
    except Exception:
        return 256
    if any(tag in kind for tag in ("v2", "v3", "v4", "v5")):
        return 128
    return 256


def _footprint_bytes(tb, E, D, NHp):
    """Per-step VMEM footprint estimate (single-buffered resident weights)."""
    resident = E * D * 2 + D * NHp * 2 + NHp * 4          # w1, w2 (bf16), bias (f32)
    io = 2 * tb * E * 2 + 2 * tb * NHp * 2                # double-buffered x / out tiles
    tmps = tb * D * 4 + tb * D * 2 + tb * NHp * 4          # h (f32), hn (bf16), out (f32)
    return resident + io + tmps


def _choose_tb(B, E, D, NHp, vmem_budget, requested=None):
    """Batch-tile size: multiple of 16, >=4 grid steps when possible, fits VMEM."""
    if requested is not None:
        return max(8, _round_up(min(requested, max(B, 8)), 8))
    tb = min(512, max(16, pl.cdiv(B, 4)))          # aim for >= 4 grid steps
    tb = min(_round_up(tb, 16), _round_up(max(B, 16), 16))
    # Shrink (relevant on v7x's 64 MiB VMEM at large D / NHp) until it fits.
    while tb > 16 and _footprint_bytes(tb, E, D, NHp) > vmem_budget:
        tb = max(16, _round_up(tb // 2, 16))
    return tb


# ---------------------------------------------------------------------------
# Offline weight preparation (fold LN affine into fc2, MXU-native lane pad)
# ---------------------------------------------------------------------------
def prepare_fused_router_weights(w1, gamma, beta, w2, *, lane_pad=None):
    """One-time (offline) weight preparation.

    Args:
      w1: [E, D]  fc1 weight, pre-transposed ([in, out]).
      gamma, beta: [D] LayerNorm affine params.
      w2: [D, N + H]  fc2 weight, pre-transposed.
      lane_pad: output-lane multiple; None -> generation-aware default.
    Returns:
      (w1 [E, D], w2_fused [D, NHp] bf16, bias [1, NHp] f32, NHp)
    """
    if lane_pad is None:
        lane_pad = _default_lane_pad()
    D, NH = w2.shape
    w2_f32 = w2.astype(jnp.float32)
    g_f32 = gamma.astype(jnp.float32)
    b_f32 = beta.astype(jnp.float32)

    # (norm * gamma + beta) @ w2 == norm @ (diag(gamma) @ w2) + beta @ w2
    w2_scaled = w2_f32 * g_f32[:, None]
    bias = b_f32[None, :] @ w2_f32                 # [1, NH], f32 for precision

    NHp = _round_up(NH, lane_pad)
    pad = NHp - NH
    w2_fused = jnp.pad(w2_scaled, ((0, 0), (0, pad))).astype(w1.dtype)
    bias_p = jnp.pad(bias, ((0, 0), (0, pad)))
    return w1, w2_fused, bias_p, NHp


# ---------------------------------------------------------------------------
# Forward
# ---------------------------------------------------------------------------
def fused_router_forward(x, w1, w2_fused, bias, total_neurons, num_heads,
                         *, tb=None):
    """Pallas implementation of FusedRouter.forward.

    Args:
      x:         [B, E]      input (bf16)
      w1:        [E, D]      fc1 weight (pre-transposed, bf16)
      w2_fused:  [D, NHp]    gamma-folded, lane-padded fc2 weight (bf16)
      bias:      [1, NHp]    beta @ w2, lane-padded (f32)
      total_neurons: N = 4 * E
      num_heads:     H
    Returns:
      (neurons [B, N], heads [B, H])
    """
    B, E = x.shape
    D = w1.shape[1]
    NHp = w2_fused.shape[1]
    N = total_neurons
    H = num_heads

    # Generation-aware VMEM budget: physical capacity minus ~16 MiB headroom
    # for compiler-internal scratch (v5e/v6e ~112 MiB, v7x ~48 MiB).
    capacity = _vmem_capacity_bytes()
    budget = max(24 << 20, capacity - (16 << 20))

    tb = _choose_tb(B, E, D, NHp, budget, requested=tb)
    # No host-side batch padding / trimming: ragged last tile handled by the
    # Blocked BlockSpec (padded edge reads, masked edge stores).
    grid = (pl.cdiv(B, tb),)

    vmem_limit = max(32 << 20,
                     min(2 * _footprint_bytes(tb, E, D, NHp) + (2 << 20), budget))

    def build(single_buffer_weights):
        resident_kwargs = (
            dict(pipeline_mode=pl.Buffered(1)) if single_buffer_weights else {}
        )
        in_specs = [
            pl.BlockSpec((tb, E), lambda i: (i, 0)),                       # x tile
            pl.BlockSpec((E, D), lambda i: (0, 0), **resident_kwargs),     # w1
            pl.BlockSpec((D, NHp), lambda i: (0, 0), **resident_kwargs),   # fused fc2
            pl.BlockSpec((1, NHp), lambda i: (0, 0), **resident_kwargs),   # folded bias
        ]
        return pl.pallas_call(
            _fused_router_kernel,
            out_shape=jax.ShapeDtypeStruct((B, NHp), x.dtype),
            grid_spec=pltpu.PrefetchScalarGridSpec(
                num_scalar_prefetch=0,
                grid=grid,
                in_specs=in_specs,
                out_specs=pl.BlockSpec((tb, NHp), lambda i: (i, 0)),
            ),
            compiler_params=pltpu.CompilerParams(
                dimension_semantics=("parallel",),
                vmem_limit_bytes=int(vmem_limit),
            ),
        )

    try:
        out = build(True)(x, w1, w2_fused, bias)
        jax.block_until_ready(out)
    except Exception:
        # Fallback: let Mosaic pick default buffering for the resident weights.
        out = build(False)(x, w1, w2_fused, bias)

    return out[:, :N], out[:, N:N + H]


# ---------------------------------------------------------------------------
# Pure-JAX reference of the original (unfused) module math, in f32.
# ---------------------------------------------------------------------------
def fused_router_reference(x, w1, gamma, beta, w2, total_neurons):
    h = x.astype(jnp.float32) @ w1.astype(jnp.float32)
    mean = jnp.mean(h, axis=-1, keepdims=True)
    var = jnp.mean(jnp.square(h - mean), axis=-1, keepdims=True)
    hn = (h - mean) * jax.lax.rsqrt(var + 1e-5)
    hn = hn * gamma.astype(jnp.float32) + beta.astype(jnp.float32)
    out = hn @ w2.astype(jnp.float32)
    return out[:, :total_neurons], out[:, total_neurons:]


if __name__ == "__main__":
    # Small shapes consistent with FusedRouter(embed_dim, num_heads, dim=...).
    # B is deliberately NOT a multiple of the batch tile to exercise the
    # ragged-edge-tile path (no host-side pad/trim).
    B = 50
    embed_dim = 32
    num_heads = 8
    dim = 128                            # router hidden dim (default 1024, shrunk)
    total_neurons = embed_dim * 4        # 128
    out_dim = total_neurons + num_heads  # 136 (lane-padded inside prep)

    key = jax.random.PRNGKey(0)
    kx, k1, k2, kg, kb = jax.random.split(key, 5)
    dtype = jnp.bfloat16  # TPU stand-in for torch.float16

    x = jax.random.normal(kx, (B, embed_dim), dtype=jnp.float32).astype(dtype)
    # nn.Linear weights: stored here pre-transposed to [in, out].
    w1 = (jax.random.normal(k1, (embed_dim, dim), dtype=jnp.float32)
          * (1.0 / jnp.sqrt(embed_dim))).astype(dtype)
    w2 = (jax.random.normal(k2, (dim, out_dim), dtype=jnp.float32)
          * (1.0 / jnp.sqrt(dim))).astype(dtype)
    # Non-trivial LayerNorm affine so the weight-fold is actually exercised.
    gamma = (1.0 + 0.1 * jax.random.normal(kg, (dim,), dtype=jnp.float32)
             ).astype(dtype)
    beta = (0.1 * jax.random.normal(kb, (dim,), dtype=jnp.float32)).astype(dtype)

    # One-time weight preparation (fold LN affine into fc2, MXU-native pad).
    w1p, w2_fused, bias, _ = prepare_fused_router_weights(w1, gamma, beta, w2)

    neurons, heads = fused_router_forward(
        x, w1p, w2_fused, bias, total_neurons, num_heads)
    jax.block_until_ready((neurons, heads))

    # Sanity check against pure-JAX reference of the original module math.
    ref_n, ref_h = fused_router_reference(x, w1, gamma, beta, w2, total_neurons)
    assert neurons.shape == (B, total_neurons)
    assert heads.shape == (B, num_heads)
    assert jnp.allclose(neurons.astype(jnp.float32), ref_n, atol=5e-2, rtol=5e-2)
    assert jnp.allclose(heads.astype(jnp.float32), ref_h, atol=5e-2, rtol=5e-2)

    # TODO(synk): select_neurons_heads (topk / nonzero) produces data-dependent
    # shapes and is left outside the kernel (host-side jnp if needed).

    print("KERNEL_OK")
</pallas_src>

<mosaic_0001>
module attributes {stable_mosaic.version = 11 : i64} {
  func.func @_fused_router_kernel(%arg0: i32, %arg1: memref<16x32xbf16, #tpu.memory_space<vmem>>, %arg2: memref<32x128xbf16, #tpu.memory_space<vmem>>, %arg3: memref<128x256xbf16, #tpu.memory_space<vmem>>, %arg4: memref<1x256xf32, #tpu.memory_space<vmem>>, %arg5: memref<16x256xbf16, #tpu.memory_space<vmem>>) attributes {dimension_semantics = [#tpu.dimension_semantics<parallel>], iteration_bounds = array<i64: 4>, scalar_prefetch = 0 : i64, scratch_operands = 0 : i64, tpu.core_type = #tpu.core_type<tc>, window_params = [{transform_indices = @transform_0, window_bounds = array<i64: 16, 32>}, {pipeline_mode = #tpu.pipeline_mode<synchronous>, transform_indices = @transform_1, window_bounds = array<i64: 32, 128>}, {pipeline_mode = #tpu.pipeline_mode<synchronous>, transform_indices = @transform_2, window_bounds = array<i64: 128, 256>}, {pipeline_mode = #tpu.pipeline_mode<synchronous>, transform_indices = @transform_3, window_bounds = array<i64: 1, 256>}, {transform_indices = @transform_4, window_bounds = array<i64: 16, 256>}]} {
    %c0 = arith.constant 0 : index
    %c0_0 = arith.constant 0 : index
    %0 = vector.load %arg1[%c0, %c0_0] : memref<16x32xbf16, #tpu.memory_space<vmem>>, vector<16x32xbf16>
    %c0_1 = arith.constant 0 : index
    %c0_2 = arith.constant 0 : index
    %1 = vector.load %arg2[%c0_1, %c0_2] : memref<32x128xbf16, #tpu.memory_space<vmem>>, vector<32x128xbf16>
    %cst = arith.constant dense<0.000000e+00> : vector<16x128xf32>
    %2 = tpu.matmul %0, %1, %cst {dimension_numbers = #tpu.dot_dimension_numbers<[1], [0], [0], [1], [0, 0, 1, 1], [], []>} : vector<16x32xbf16>, vector<32x128xbf16>, vector<16x128xf32> -> vector<16x128xf32>
    %cst_3 = arith.constant dense<0.000000e+00> : vector<16xf32>
    %3 = vector.multi_reduction <add>, %2, %cst_3 [1] : vector<16x128xf32> to vector<16xf32>
    %4 = vector.shape_cast %3 : vector<16xf32> to vector<16x1xf32>
    %cst_4 = arith.constant 1.280000e+02 : f32
    %5 = vector.broadcast %cst_4 : f32 to vector<16x1xf32>
    %6 = arith.divf %4, %5 : vector<16x1xf32>
    %7 = vector.broadcast %6 : vector<16x1xf32> to vector<16x128xf32>
    %8 = arith.subf %2, %7 : vector<16x128xf32>
    %9 = arith.mulf %8, %8 : vector<16x128xf32>
    %cst_5 = arith.constant dense<0.000000e+00> : vector<16xf32>
    %10 = vector.multi_reduction <add>, %9, %cst_5 [1] : vector<16x128xf32> to vector<16xf32>
    %11 = vector.shape_cast %10 : vector<16xf32> to vector<16x1xf32>
    %cst_6 = arith.constant 1.280000e+02 : f32
    %12 = vector.broadcast %cst_6 : f32 to vector<16x1xf32>
    %13 = arith.divf %11, %12 : vector<16x1xf32>
    %cst_7 = arith.constant 9.99999974E-6 : f32
    %14 = vector.broadcast %cst_7 : f32 to vector<16x1xf32>
    %15 = arith.addf %13, %14 : vector<16x1xf32>
    %16 = math.rsqrt %15 : vector<16x1xf32>
    %17 = vector.broadcast %16 : vector<16x1xf32> to vector<16x128xf32>
    %18 = arith.mulf %8, %17 : vector<16x128xf32>
    %19 = arith.truncf %18 : vector<16x128xf32> to vector<16x128xbf16>
    %c0_8 = arith.constant 0 : index
    %c0_9 = arith.constant 0 : index
    %20 = vector.load %arg3[%c0_8, %c0_9] : memref<128x256xbf16, #tpu.memory_space<vmem>>, vector<128x256xbf16>
    %cst_10 = arith.constant dense<0.000000e+00> : vector<16x256xf32>
    %21 = tpu.matmul %19, %20, %cst_10 {dimension_numbers = #tpu.dot_dimension_numbers<[1], [0], [0], [1], [0, 0, 1, 1], [], []>} : vector<16x128xbf16>, vector<128x256xbf16>, vector<16x256xf32> -> vector<16x256xf32>
    %c0_11 = arith.constant 0 : index
    %c0_12 = arith.constant 0 : index
    %22 = vector.load %arg4[%c0_11, %c0_12] : memref<1x256xf32, #tpu.memory_space<vmem>>, vector<1x256xf32>
    %23 = vector.broadcast %22 : vector<1x256xf32> to vector<16x256xf32>
    %24 = arith.addf %21, %23 : vector<16x256xf32>
    %25 = arith.truncf %24 : vector<16x256xf32> to vector<16x256xbf16>
    %c0_13 = arith.constant 0 : index
    %c0_14 = arith.constant 0 : index
    %26 = vector.load %arg5[%c0_13, %c0_14] : memref<16x256xbf16, #tpu.memory_space<vmem>>, vector<16x256xbf16>
    tpu.vector_store %arg5[%c0_13, %c0_14], %25 {strides = array<i32>} : memref<16x256xbf16, #tpu.memory_space<vmem>>, vector<16x256xbf16>,
    return
  }
  func.func @transform_0(%arg0: i32) -> (i32, i32) {
    %c0_i32 = arith.constant 0 : i32
    %c0_i32_0 = arith.constant 0 : i32
    return %arg0, %c0_i32 : i32, i32
  }
  func.func @transform_1(%arg0: i32) -> (i32, i32) {
    %c0_i32 = arith.constant 0 : i32
    %c0_i32_0 = arith.constant 0 : i32
    %c0_i32_1 = arith.constant 0 : i32
    return %c0_i32, %c0_i32_0 : i32, i32
  }
  func.func @transform_2(%arg0: i32) -> (i32, i32) {
    %c0_i32 = arith.constant 0 : i32
    %c0_i32_0 = arith.constant 0 : i32
    %c0_i32_1 = arith.constant 0 : i32
    return %c0_i32, %c0_i32_0 : i32, i32
  }
  func.func @transform_3(%arg0: i32) -> (i32, i32) {
    %c0_i32 = arith.constant 0 : i32
    %c0_i32_0 = arith.constant 0 : i32
    %c0_i32_1 = arith.constant 0 : i32
    return %c0_i32, %c0_i32_0 : i32, i32
  }
  func.func @transform_4(%arg0: i32) -> (i32, i32) {
    %c0_i32 = arith.constant 0 : i32
    %c0_i32_0 = arith.constant 0 : i32
    return %arg0, %c0_i32 : i32, i32
  }
}

module attributes {stable_mosaic.version = 11 : i64} {
  func.func @_fused_router_kernel(%arg0: i32, %arg1: memref<16x32xbf16, #tpu.memory_space<vmem>>, %arg2: memref<32x128xbf16, #tpu.memory_space<vmem>>, %arg3: memref<128x256xbf16, #tpu.memory_space<vmem>>, %arg4: memref<1x256xf32, #tpu.memory_space<vmem>>, %arg5: memref<16x256xbf16, #tpu.memory_space<vmem>>) attributes {dimension_semantics = [#tpu.dimension_semantics<parallel>], iteration_bounds = array<i64: 4>, scalar_prefetch = 0 : i64, scratch_operands = 0 : i64, tpu.core_type = #tpu.core_type<tc>, window_params = [{transform_indices = @transform_0, window_bounds = array<i64: 16, 32>}, {pipeline_mode = #tpu.pipeline_mode<synchronous>, transform_indices = @transform_1, window_bounds = array<i64: 32, 128>}, {pipeline_mode = #tpu.pipeline_mode<synchronous>, transform_indices = @transform_2, window_bounds = array<i64: 128, 256>}, {pipeline_mode = #tpu.pipeline_mode<synchronous>, transform_indices = @transform_3, window_bounds = array<i64: 1, 256>}, {transform_indices = @transform_4, window_bounds = array<i64: 16, 256>}]} {
    %c0 = arith.constant 0 : index
    %c0_0 = arith.constant 0 : index
    %0 = vector.load %arg1[%c0, %c0_0] : memref<16x32xbf16, #tpu.memory_space<vmem>>, vector<16x32xbf16>
    %c0_1 = arith.constant 0 : index
    %c0_2 = arith.constant 0 : index
    %1 = vector.load %arg2[%c0_1, %c0_2] : memref<32x128xbf16, #tpu.memory_space<vmem>>, vector<32x128xbf16>
    %cst = arith.constant dense<0.000000e+00> : vector<16x128xf32>
    %2 = tpu.matmul %0, %1, %cst {dimension_numbers = #tpu.dot_dimension_numbers<[1], [0], [0], [1], [0, 0, 1, 1], [], []>} : vector<16x32xbf16>, vector<32x128xbf16>, vector<16x128xf32> -> vector<16x128xf32>
    %cst_3 = arith.constant dense<0.000000e+00> : vector<16xf32>
    %3 = vector.multi_reduction <add>, %2, %cst_3 [1] : vector<16x128xf32> to vector<16xf32>
    %4 = vector.shape_cast %3 : vector<16xf32> to vector<16x1xf32>
    %cst_4 = arith.constant 1.280000e+02 : f32
    %5 = vector.broadcast %cst_4 : f32 to vector<16x1xf32>
    %6 = arith.divf %4, %5 : vector<16x1xf32>
    %7 = vector.broadcast %6 : vector<16x1xf32> to vector<16x128xf32>
    %8 = arith.subf %2, %7 : vector<16x128xf32>
    %9 = arith.mulf %8, %8 : vector<16x128xf32>
    %cst_5 = arith.constant dense<0.000000e+00> : vector<16xf32>
    %10 = vector.multi_reduction <add>, %9, %cst_5 [1] : vector<16x128xf32> to vector<16xf32>
    %11 = vector.shape_cast %10 : vector<16xf32> to vector<16x1xf32>
    %cst_6 = arith.constant 1.280000e+02 : f32
    %12 = vector.broadcast %cst_6 : f32 to vector<16x1xf32>
    %13 = arith.divf %11, %12 : vector<16x1xf32>
    %cst_7 = arith.constant 9.99999974E-6 : f32
    %14 = vector.broadcast %cst_7 : f32 to vector<16x1xf32>
    %15 = arith.addf %13, %14 : vector<16x1xf32>
    %16 = math.rsqrt %15 : vector<16x1xf32>
    %17 = vector.broadcast %16 : vector<16x1xf32> to vector<16x128xf32>
    %18 = arith.mulf %8, %17 : vector<16x128xf32>
    %19 = arith.truncf %18 : vector<16x128xf32> to vector<16x128xbf16>
    %c0_8 = arith.constant 0 : index
    %c0_9 = arith.constant 0 : index
    %20 = vector.load %arg3[%c0_8, %c0_9] : memref<128x256xbf16, #tpu.memory_space<vmem>>, vector<128x256xbf16>
    %cst_10 = arith.constant dense<0.000000e+00> : vector<16x256xf32>
    %21 = tpu.matmul %19, %20, %cst_10 {dimension_numbers = #tpu.dot_dimension_numbers<[1], [0], [0], [1], [0, 0, 1, 1], [], []>} : vector<16x128xbf16>, vector<128x256xbf16>, vector<16x256xf32> -> vector<16x256xf32>
    %c0_11 = arith.constant 0 : index
    %c0_12 = arith.constant 0 : index
    %22 = vector.load %arg4[%c0_11, %c0_12] : memref<1x256xf32, #tpu.memory_space<vmem>>, vector<1x256xf32>
    %23 = vector.broadcast %22 : vector<1x256xf32> to vector<16x256xf32>
    %24 = arith.addf %21, %23 : vector<16x256xf32>
    %25 = arith.truncf %24 : vector<16x256xf32> to vector<16x256xbf16>
    %c0_13 = arith.constant 0 : index
    %c0_14 = arith.constant 0 : index
    %26 = vector.load %arg5[%c0_13, %c0_14] : memref<16x256xbf16, #tpu.memory_space<vmem>>, vector<16x256xbf16>
    tpu.vector_store %arg5[%c0_13, %c0_14], %25 {strides = array<i32>} : memref<16x256xbf16, #tpu.memory_space<vmem>>, vector<16x256xbf16>,
    return
  }
  func.func @transform_0(%arg0: i32) -> (i32, i32) {
    %c0_i32 = arith.constant 0 : i32
    %c0_i32_0 = arith.constant 0 : i32
    return %arg0, %c0_i32 : i32, i32
  }
  func.func @transform_1(%arg0: i32) -> (i32, i32) {
    %c0_i32 = arith.constant 0 : i32
    %c0_i32_0 = arith.constant 0 : i32
    %c0_i32_1 = arith.constant 0 : i32
    return %c0_i32, %c0_i32_0 : i32, i32
  }
  func.func @transform_2(%arg0: i32) -> (i32, i32) {
    %c0_i32 = arith.constant 0 : i32
    %c0_i32_0 = arith.constant 0 : i32
    %c0_i32_1 = arith.constant 0 : i32
    return %c0_i32, %c0_i32_0 : i32, i32
  }
  func.func @transform_3(%arg0: i32) -> (i32, i32) {
    %c0_i32 = arith.constant 0 : i32
    %c0_i32_0 = arith.constant 0 : i32
    %c0_i32_1 = arith.constant 0 : i32
    return %c0_i32, %c0_i32_0 : i32, i32
  }
  func.func @transform_4(%arg0: i32) -> (i32, i32) {
    %c0_i32 = arith.constant 0 : i32
    %c0_i32_0 = arith.constant 0 : i32
    return %arg0, %c0_i32 : i32, i32
  }
}

</mosaic_0001>

<bundles_post_ra>
// kernel: tpu_custom_call.1
= control target key start
LH: loop header
LB: loop body
LE: loop exit
PB: predicated region body
PF: predicated region fallthrough
CT: control target
= control target key end

     0   :  { %9 = vsyncpa [#allocation3], 0  ;;  %s1029_s0 = inlined_call_operand.vmem [shape: bf16[50,32], index: 0, kind: input, shape index: {}]   ;;  %s1030_s1 = inlined_call_operand.vmem [shape: bf16[32,128], index: 1, kind: input, shape index: {}]   ;;  %s1031_s2 = inlined_call_operand.hbm [shape: bf16[128,256], index: 2, kind: input, shape index: {}]   ;;  %s1032_s3 = inlined_call_operand.vmem [shape: f32[1,256], index: 3, kind: input, shape index: {}]   ;;  %s1033_s4 = inlined_call_operand.hbm [shape: bf16[50,256], index: 4, kind: output, shape index: {}]  }
   0x1   :  { %10 = vsyncpa [#allocation4], 0 }
   0x2   :  { %12 = vsyncpa [#allocation4 + $0x1], 0  ;;  %s868_s15 = smov 0   ;;  %s870_s16 = smov 0  }
   0x3   :  { %s872_s17 = smov 0   ;;  %s874_s18 = smov 0  }
   0x4 LB: > { %s889_s19 = sadd.s32 4294967295, %s832_s18   ;;  %s593_s20 = sadd.s32 4294967294, %s832_s18   ;;  %s832_s18 = sphi %s874_s18, %s1048_s18   ;;  %s828_s17 = sphi %s872_s17, %s1047_s17   ;;  %s824_s16 = sphi %s870_s16, %s1046_s16   ;;  %s820_s15 = sphi %s868_s15, %s1045_s15  }
   0x5   : > { %s893_s21 = sadd.s32 1, %s832_s18   ;;  %s114_s22 = sadd.s32 1, %s828_s17 }
   0x6   : > { %s111_s23 = ssub.s32 %s832_s18, %s893_s21  ;;  %p124_p0 = scmp.ne.s32.totalorder %s828_s17, %s824_s16 }
   0x7   : > { %p112_p1 = scmp.eq.s32.totalorder %s111_s23, 0  ;;  %p125_p2 = scmp.eq.s32.totalorder %s889_s19, 3 }
   0x8   : > { %p130_p3 = scmp.ne.s32.totalorder %s824_s16, %s820_s15  ;;  %p131_p4 = scmp.eq.s32.totalorder %s593_s20, 3 }
   0x9   : > { %s904_s24 = scalar_select %p112_p1, %s828_s17, %s114_s22  }
   0xa   : > { %p906_p5 = por %p125_p2, %p124_p0  ;;  %p910_p6 = por %p131_p4, %p130_p3 }
   0xb   : > { %p594_p7 = scmp.ge.s32.totalorder %s832_s18, 1  ;;  %p138_p8 = scmp.lt.s32.totalorder %s832_s18, 5 }
   0xc   : > { %s1036_s25 = scalar_select %p906_p5, 1, 0 }
   0xd   : > { %s1037_s26 = scalar_select %p910_p6, 1, 0 }
   0xe   : > { %p1034_p9 = scmp.eq.s32.totalorder %s889_s19, 0  ;;  %p917_p10 = pnand %p594_p7, %p138_p8 }
   0xf   : > { %s834_s28 = smov [#allocation2]   ;;  %s738_s7 = scalar_lea.hbm %s1031_s2, 2048 }
  0x10   : > { %s1038_s27 = scalar_select %p917_p10, 1, 0 }
  0x11   : > { %s153_s29 = sshll.u32 %s834_s28, 4  ;;  %p656_p11 = pneg %p917_p10  ;;  %s154_s29 = int_to_ptr.vmem [resolvable:$true] %s153_s29 }
  0x12   : > { %p739_p13 = scmp.ne.s32.totalorder %s1031_s2, %s738_s7  ;;  %p745_p3 = scmp.lt.u32.totalorder %s738_s7, %s1031_s2 }
  0x13   : > { %p925_p12 = pnand %p1034_p9, %p656_p11 }
  0x15   : > { %p740_p0 = pneg %p925_p12 }
  0x17   : > { %p741_p1 = pnand %p740_p0, %p739_p13 }
  0x19   : > { %p742_p2 = pneg %p741_p1 }
  0x1b   : > { %p747_p4 = pnand %p745_p3, %p742_p2 }
  0x1d   : > { %750 = shalt.err (!%p747_p4)
}
  0x1e   : > { %s751_s12 = scalar_lea.vmem %s154_s29, 2048  ;;  %p759_p9 = scmp.lt.s32.totalorder %s154_s29, %s154_s29 }
  0x1f   : > { %p752_p7 = scmp.ne.s32.totalorder %s154_s29, %s751_s12  ;;  %p760_p6 = scmp.lt.s32.totalorder %s751_s12, %s751_s12 }
  0x21   : > { %p754_p8 = pnand %p752_p7, %p740_p0  ;;  %p761_p5 = por %p760_p6, %p759_p9 }
  0x23   : > { %p755_p11 = pneg %p754_p8 }
  0x25   : > { %p762_p10 = pnand %p761_p5, %p755_p11 }
  0x27   : > { %765 = shalt.err (!%p762_p10)
}
  0x28   : > { %s835_s13 = smov 128   ;;  %s836_s14 = smov 8  }
  0x29   : > { %659 = dma.hbm_to_vmem [thread:$0]  (!%p925_p12), %s1031_s2, 2048, %s154_s29, [#allocation3], %s835_s13, %s835_s13, %s836_s14  }
  0x2a   : > { %p1040_p13 = scmp.ne.s32.totalorder %s1038_s27, 0 }
  0x2b   : > { %p1041_p1 = scmp.eq.s32.totalorder (!%p1040_p13), %s889_s19, 0 }
  0x2c   : > { %189 = sbr.rel (%p1040_p13) target bundleno = 834 (0x342), region = 36 }
  0x33   : > { %811 = dma.done.wait (%p1041_p1), [#allocation3], 2048   ;;  %p1042_p0 = pmov %p1041_p1 }
  0x34   : > { %s952_s23 = sshll.u32 %s889_s19, 1  ;;  %v837_v0 = vmov 0.0   ;;  %vm838_vm0 = vmmov 0   ;;  %v707_v1 = vld [vmem:[%s1030_s1] sm:$0xff]   ;;  %v708_v2 = vld [vmem:[%s1030_s1 + $0x8] sm:$0xff]   ;;  %vm263_vm1 = vcmask 261120   ;;  %v350_v44 = vlaneseq }
  0x35   : > { %813 = vsyncadd (%p1042_p0), [#allocation3], 4294965248  ;;  %643 = vmatprep.subr.bf16.mxu0 %v837_v0  ;;  %647 = vmatprep.mubr.msk.bf16.mxu0 %vm838_vm0, %v837_v0  ;;  %p224_p5 = scmp.lt.s32.totalorder %s952_s23, 6  ;;  %v710_v8 = vld [vmem:[#allocation2 + $0x4] ss:$8 sps:$4 sm:$0xff]   ;;  %v839_v29 = vmov 0  }
  0x36   : > { %644 = vmatpush3.bf16.msra.mxu0 %v707_v1  ;;  %v712_v9 = vld [vmem:[#allocation2] ss:$8 sps:$4 sm:$0xff]   ;;  %v713_v10 = vld [vmem:[#allocation2 + $0x14] ss:$8 sps:$4 sm:$0xff]   ;;  %440 = vmatprep.subr.bf16.mxu1 %v710_v8  ;;  %v715_v11 = vld [vmem:[#allocation2 + $0x10] ss:$8 sps:$4 sm:$0xff]  }
  0x37   : > { %s225_s28 = scalar_select %p224_p5, %s952_s23, 6  ;;  %645 = vmatprep.subr.bf16.mxu0 %v837_v0  ;;  %441 = vmatpush1.bf16.msra.mxu1 %v712_v9  ;;  %v716_v12 = vld [vmem:[#allocation2 + $0x24] ss:$8 sps:$4 sm:$0xff]   ;;  %v718_v21 = vld [vmem:[#allocation2 + $0x20] ss:$8 sps:$4 sm:$0xff]   ;;  %v351_v45 = vshrl.u32 %v350_v44, 7 }
  0x38   : > { %442 = vmatprep.subr.bf16.mxu1 %v713_v10  ;;  %v719_v22 = vld [vmem:[#allocation2 + $0x34] ss:$8 sps:$4 sm:$0xff]   ;;  %v721_v23 = vld [vmem:[#allocation2 + $0x30] ss:$8 sps:$4 sm:$0xff]   ;;  %v722_v24 = vld [vmem:[#allocation2 + $0x44] ss:$8 sps:$4 sm:$0xff]   ;;  %472 = vmatprep.mubr.bf16.mxu1 %v839_v29 }
  0x39   : > { %s601_s29 = sshll.u32 %s225_s28, 2  ;;  %v724_v25 = vld [vmem:[#allocation2 + $0x40] ss:$8 sps:$4 sm:$0xff]   ;;  %v725_v26 = vld [vmem:[#allocation2 + $0x54] ss:$8 sps:$4 sm:$0xff]   ;;  %s216_s10 = sand.u32 1, %s824_s16  }
  0x3a   : > { %s227_s7 = scalar_lea.vmem %s1029_s0, %s601_s29  ;;  %646 = vmatpush3.bf16.msra.mxu0 %v708_v2  ;;  %v727_v27 = vld [vmem:[#allocation2 + $0x50] ss:$8 sps:$4 sm:$0xff]   ;;  %v728_v28 = vld [vmem:[#allocation2 + $0x64] ss:$8 sps:$4 sm:$0xff]   ;;  %v730_v30 = vld [vmem:[#allocation2 + $0x60] ss:$8 sps:$4 sm:$0xff]  }
  0x3b   : > { %v709_v3 = vld [vmem:[%s227_s7] sm:$0xff]   ;;  %443 = vmatpush1.bf16.msra.mxu1 %v715_v11  ;;  %v352_v46 = vsub.s32 0, %v351_v45  ;;  %v356_v48 = vsub.s32 1, %v351_v45  ;;  %s599_s13 = sshll.u32 %s216_s10, 4  ;;  %s969_s20 = scalar_lea.sflag [#allocation4], %s216_s10 }
  0x3c   : > { %444 = vmatprep.subr.bf16.mxu1 %v716_v12  ;;  %v731_v31 = vld [vmem:[#allocation2 + $0x74] ss:$8 sps:$4 sm:$0xff]   ;;  %v733_v32 = vld [vmem:[#allocation2 + $0x70] ss:$8 sps:$4 sm:$0xff]   ;;  %s218_s14 = scalar_lea.vmem [#allocation5], %s599_s13  ;;  %p1043_p6 = scmp.ne.s32.totalorder %s1036_s25, 0 }
  0x3d   : > { %648 = vmatmul.mubr.msk.bf16.vlgmr.msra.gmra.mrb[0].mxu0 %vm263_vm1, %v709_v3  ;;  %v348_v47 = vld [vmem:[%s1032_s3] sm:$0x3]  ;;  %s506_s22 = ssub.s32 (%p1043_p6), 7, %s952_s23 }
  0x3e   : > { %v353_v49 = vrot.slane %v348_v47, %v352_v46  ;;  %v357_v50 = vrot.slane %v348_v47, %v356_v48  ;;  %p507_p9 = scmp.lt.s32.totalorder (%p1043_p6), %s506_s22, 2 }
  0x3f   : > { %445 = vmatpush1.bf16.msra.mxu1 %v718_v21 }
  0x40   : > { %446 = vmatprep.subr.bf16.mxu1 %v719_v22 }
  0x43   : > { %447 = vmatpush1.bf16.msra.mxu1 %v721_v23 }
  0x44   : > { %448 = vmatprep.subr.bf16.mxu1 %v722_v24 }
  0x47   : > { %449 = vmatpush1.bf16.msra.mxu1 %v724_v25 }
  0x48   : > { %450 = vmatprep.subr.bf16.mxu1 %v725_v26 }
  0x4b   : > { %451 = vmatpush1.bf16.msra.mxu1 %v727_v27 }
  0x4c   : > { %452 = vmatprep.subr.bf16.mxu1 %v728_v28 }
  0x4f   : > { %453 = vmatpush1.bf16.msra.mxu1 %v730_v30 }
  0x50   : > { %454 = vmatprep.subr.bf16.mxu1 %v731_v31 }
  0x53   : > { %455 = vmatpush1.bf16.msra.mxu1 %v733_v32 }
 0x110   : > { %v301_v4 = vpop.f32.mrb[0].mxu0 }
 0x111   : > { %308 = vadd.xlane.f32.xlu0 %v301_v4  ;;  %v649_v5 = vpop.f32.mrb[1].mxu0 }
 0x112   : > { %v304_v6 = vpop.f32.mrb[2].mxu0 }
 0x113   : > { %v650_v7 = vpop.f32.mrb[3].mxu0 }
 0x115   : > { %310 = vadd.xlane.f32.xlu0 %v304_v6 }
 0x19e   : > { %v309_v13 = vpop.xlane.xlu0 %308 }
 0x19f   : > { %v313_v14 = vmul.f32 0.0078125, %v309_v13 }
 0x1a1   : > { %v315_v15 = vsub.f32 %v301_v4, %v313_v14 }
 0x1a2   : > { %v311_v16 = vpop.xlane.xlu0 %310 }
 0x1a3   : > { %v314_v17 = vmul.f32 0.0078125, %v311_v16  ;;  %v317_v18 = vmul.f32 %v315_v15, %v315_v15 }
 0x1a5   : > { %v316_v19 = vsub.f32 %v304_v6, %v314_v17  ;;  %319 = vadd.xlane.f32.xlu1 %v317_v18 }
 0x1a7   : > { %v318_v20 = vmul.f32 %v316_v19, %v316_v19 }
 0x1a9   : > { %321 = vadd.xlane.f32.xlu1 %v318_v20 }
 0x232   : > { %v320_v33 = vpop.xlane.xlu1 %319 }
 0x233   : > { %v323_v34 = vmul.f32 0.0078125, %v320_v33 }
 0x235   : > { %v325_v35 = vadd.f32 1e-05, %v323_v34 }
 0x236   : > { %v322_v36 = vpop.xlane.xlu1 %321 }
 0x237   : > { %v324_v37 = vmul.f32 0.0078125, %v322_v36  ;;  %734 = vrsqrt.f32 %v325_v35 }
 0x239   : > { %v326_v38 = vadd.f32 1e-05, %v324_v37 }
 0x23b   : > { %736 = vrsqrt.f32 %v326_v38 }
 0x241   : > { %v735_v39 = vpop.eup %734 }
 0x242   : > { %v329_v41 = vmul.f32 %v735_v39, %v315_v15 }
 0x245   : > { %v737_v40 = vpop.eup %736 }
 0x246   : > { %v330_v42 = vmul.f32 %v737_v40, %v316_v19 }
 0x248   : > { %v331_v43 = vpack.c.bf16 %v330_v42, %v329_v41 }
 0x24a   : > { %473 = vmatmul.mubr.bf16.vlgmr.msra.gmra.mrb[0].mxu1 %v331_v43 }
 0x31d   : > { %v474_v51 = vpop.f32.mrb[0].mxu1 }
 0x31e   : > { %v475_v52 = vadd.f32 %v474_v51, %v353_v49  ;;  %v476_v53 = vpop.f32.mrb[1].mxu1 }
 0x31f   : > { %v477_v54 = vadd.f32 %v476_v53, %v357_v50  ;;  %v478_v55 = vpop.f32.mrb[2].mxu1  ;;  %504 = sbr.rel (!%p1043_p6) target bundleno = 834 (0x342), region = 44 }
 0x320   : > { %v479_v56 = vadd.f32 %v478_v55, %v353_v49  ;;  %v480_v57 = vpop.f32.mrb[3].mxu1 }
 0x321   : > { %v635_v58 = vpack.c.bf16 %v477_v54, %v475_v52  ;;  %v481_v59 = vadd.f32 %v480_v57, %v357_v50 }
 0x323   : > { %495 = vst [vmem:[%s218_s14] sm:$0xff] %v635_v58  ;;  %v636_v60 = vpack.c.bf16 %v481_v59, %v479_v56 }
 0x325   : > { %496 = vst [vmem:[%s218_s14 + $0x8] sm:$0xff] %v636_v60 }
 0x326   : > { %s1050_s22 = smov (!%p507_p9, %s506_s22), 2 }
 0x327   : > { %s974_s28 = sshll.u32 %s1050_s22, 7 }
 0x328   : > { %s512_s29 = ssub.s32 256, %s974_s28 }
 0x329   : > { %513 = vsyncadd %s969_s20, %s512_s29  ;;  %p628_p10 = scmp.ne.s32.totalorder %s974_s28, 0  ;;  %s639_s27 = sshll.u32 %s889_s19, 8 }
 0x32a   : > { %s983_s25 = scalar_lea.hbm %s1033_s4, %s639_s27  ;;  %s519_s6 = sshll.u32 %s218_s14, 4  ;;  %s985_s6 = int_to_ptr.vmem [resolvable:$true] %s519_s6 }
 0x32b   : > { %s766_s23 = scalar_lea.vmem %s985_s6, %s974_s28  ;;  %s840_s7 = smov [#allocation5]  }
 0x32c   : > { %p767_p12 = scmp.ne.s32.totalorder %s985_s6, %s766_s23  ;;  %s770_s8 = sshll.u32 %s840_s7, 4  ;;  %s771_s8 = int_to_ptr.vmem [resolvable:$false] %s770_s8 }
 0x32d   : > { %s772_s19 = scalar_lea.vmem %s771_s8, 512  ;;  %p773_p4 = scmp.lt.s32.totalorder %s985_s6, %s771_s8 }
 0x32e   : > { %p768_p2 = pnand %p767_p12, %p628_p10  ;;  %p774_p7 = scmp.lt.s32.totalorder %s772_s19, %s766_s23 }
 0x330   : > { %p769_p3 = pneg %p768_p2  ;;  %p775_p8 = por %p774_p7, %p773_p4 }
 0x332   : > { %p776_p11 = pnand %p775_p8, %p769_p3 }
 0x334   : > { %779 = shalt.err (!%p776_p11)
}
 0x335   : > { %s780_s9 = scalar_lea.hbm %s983_s25, %s974_s28  ;;  %s784_s12 = scalar_lea.hbm %s1033_s4, 896 }
 0x336   : > { %p781_p13 = scmp.ne.s32.totalorder %s983_s25, %s780_s9  ;;  %p785_p5 = scmp.lt.u32.totalorder %s983_s25, %s1033_s4 }
 0x337   : > { %p786_p6 = scmp.lt.u32.totalorder %s784_s12, %s780_s9  ;;  %p788_p12 = scmp.lt.u32.totalorder %s780_s9, %s983_s25 }
 0x338   : > { %p782_p1 = pnand %p781_p13, %p628_p10 }
 0x339   : > { %p787_p9 = por %p786_p6, %p785_p5 }
 0x33a   : > { %p783_p0 = pneg %p782_p1 }
 0x33b   : > { %p789_p2 = por %p788_p12, %p787_p9 }
 0x33d   : > { %p790_p3 = pnand %p789_p2, %p783_p0 }
 0x33f   : > { %793 = shalt.err (!%p790_p3)
}
 0x340   : > { %s841_s22 = smov 128   ;;  %s842_s29 = smov 8  }
 0x341   : > { %525 = dma.vmem_to_hbm [thread:$0]  (%p628_p10), %s985_s6, %s974_s28, %s983_s25, %s969_s20, %s841_s22, %s841_s22, %s842_s29  }
 0x342 PF: > { %p666_p4 = scmp.ge.s32.totalorder %s832_s18, 2  ;;  %s534_s27 = sand.u32 1, %s820_s15  }
 0x343   : > { %p1044_p7 = scmp.ne.s32.totalorder %s1037_s26, 0  ;;  %s535_s30 = scalar_lea.sflag [#allocation4], %s534_s27 }
 0x345   : > { %p661_p8 = pnand %p666_p4, %p1044_p7 }
 0x347   : > { %815 = dma.done.wait (!%p661_p8), %s535_s30, 256  }
 0x348   : > { %817 = vsyncadd (!%p661_p8), %s535_s30, 4294967040  ;;  %p15_p11 = scmp.ge.s32.totalorder %s893_s21, 6   ;;  %s1045_s15 = smov %s824_s16 }
 0x349   : > { %s1046_s16 = smov %s828_s17  ;;  %s1047_s17 = smov %s904_s24 }
 0x34a   : > { %s1048_s18 = smov %s893_s21  ;;  %17 = sbr.rel (!%p15_p11) target bundleno = 4 (0x4), region = 76 }
 0x351   :  { %540 = vsyncpa [#allocation3], 1 }
 0x352   :  { %542 = vsyncpa [#allocation3 + $0x1], 1 }
 0x353   :  { %543 = vsyncpa [#allocation4], 1 }
 0x354   :  { %545 = vsyncpa [#allocation4 + $0x1], 1 }

// kernel: tpu_custom_call.1
= control target key start
LH: loop header
LB: loop body
LE: loop exit
PB: predicated region body
PF: predicated region fallthrough
CT: control target
= control target key end

     0   :  { %9 = vsyncpa [#allocation3], 0  ;;  %s1029_s0 = inlined_call_operand.vmem [shape: bf16[50,32], index: 0, kind: input, shape index: {}]   ;;  %s1030_s1 = inlined_call_operand.vmem [shape: bf16[32,128], index: 1, kind: input, shape index: {}]   ;;  %s1031_s2 = inlined_call_operand.hbm [shape: bf16[128,256], index: 2, kind: input, shape index: {}]   ;;  %s1032_s3 = inlined_call_operand.vmem [shape: f32[1,256], index: 3, kind: input, shape index: {}]   ;;  %s1033_s4 = inlined_call_operand.hbm [shape: bf16[50,256], index: 4, kind: output, shape index: {}]  }
   0x1   :  { %10 = vsyncpa [#allocation4], 0 }
   0x2   :  { %12 = vsyncpa [#allocation4 + $0x1], 0  ;;  %s868_s15 = smov 0   ;;  %s870_s16 = smov 0  }
   0x3   :  { %s872_s17 = smov 0   ;;  %s874_s18 = smov 0  }
   0x4 LB: > { %s889_s19 = sadd.s32 4294967295, %s832_s18   ;;  %s593_s20 = sadd.s32 4294967294, %s832_s18   ;;  %s832_s18 = sphi %s874_s18, %s1048_s18   ;;  %s828_s17 = sphi %s872_s17, %s1047_s17   ;;  %s824_s16 = sphi %s870_s16, %s1046_s16   ;;  %s820_s15 = sphi %s868_s15, %s1045_s15  }
   0x5   : > { %s893_s21 = sadd.s32 1, %s832_s18   ;;  %s114_s22 = sadd.s32 1, %s828_s17 }
   0x6   : > { %s111_s23 = ssub.s32 %s832_s18, %s893_s21  ;;  %p124_p0 = scmp.ne.s32.totalorder %s828_s17, %s824_s16 }
   0x7   : > { %p112_p1 = scmp.eq.s32.totalorder %s111_s23, 0  ;;  %p125_p2 = scmp.eq.s32.totalorder %s889_s19, 3 }
   0x8   : > { %p130_p3 = scmp.ne.s32.totalorder %s824_s16, %s820_s15  ;;  %p131_p4 = scmp.eq.s32.totalorder %s593_s20, 3 }
   0x9   : > { %s904_s24 = scalar_select %p112_p1, %s828_s17, %s114_s22  }
   0xa   : > { %p906_p5 = por %p125_p2, %p124_p0  ;;  %p910_p6 = por %p131_p4, %p130_p3 }
   0xb   : > { %p594_p7 = scmp.ge.s32.totalorder %s832_s18, 1  ;;  %p138_p8 = scmp.lt.s32.totalorder %s832_s18, 5 }
   0xc   : > { %s1036_s25 = scalar_select %p906_p5, 1, 0 }
   0xd   : > { %s1037_s26 = scalar_select %p910_p6, 1, 0 }
   0xe   : > { %p1034_p9 = scmp.eq.s32.totalorder %s889_s19, 0  ;;  %p917_p10 = pnand %p594_p7, %p138_p8 }
   0xf   : > { %s834_s28 = smov [#allocation2]   ;;  %s738_s7 = scalar_lea.hbm %s1031_s2, 2048 }
  0x10   : > { %s1038_s27 = scalar_select %p917_p10, 1, 0 }
  0x11   : > { %s153_s29 = sshll.u32 %s834_s28, 4  ;;  %p656_p11 = pneg %p917_p10  ;;  %s154_s29 = int_to_ptr.vmem [resolvable:$true] %s153_s29 }
  0x12   : > { %p739_p13 = scmp.ne.s32.totalorder %s1031_s2, %s738_s7  ;;  %p745_p3 = scmp.lt.u32.totalorder %s738_s7, %s1031_s2 }
  0x13   : > { %p925_p12 = pnand %p1034_p9, %p656_p11 }
  0x15   : > { %p740_p0 = pneg %p925_p12 }
  0x17   : > { %p741_p1 = pnand %p740_p0, %p739_p13 }
  0x19   : > { %p742_p2 = pneg %p741_p1 }
  0x1b   : > { %p747_p4 = pnand %p745_p3, %p742_p2 }
  0x1d   : > { %750 = shalt.err (!%p747_p4)
}
  0x1e   : > { %s751_s12 = scalar_lea.vmem %s154_s29, 2048  ;;  %p759_p9 = scmp.lt.s32.totalorder %s154_s29, %s154_s29 }
  0x1f   : > { %p752_p7 = scmp.ne.s32.totalorder %s154_s29, %s751_s12  ;;  %p760_p6 = scmp.lt.s32.totalorder %s751_s12, %s751_s12 }
  0x21   : > { %p754_p8 = pnand %p752_p7, %p740_p0  ;;  %p761_p5 = por %p760_p6, %p759_p9 }
  0x23   : > { %p755_p11 = pneg %p754_p8 }
  0x25   : > { %p762_p10 = pnand %p761_p5, %p755_p11 }
  0x27   : > { %765 = shalt.err (!%p762_p10)
}
  0x28   : > { %s835_s13 = smov 128   ;;  %s836_s14 = smov 8  }
  0x29   : > { %659 = dma.hbm_to_vmem [thread:$0]  (!%p925_p12), %s1031_s2, 2048, %s154_s29, [#allocation3], %s835_s13, %s835_s13, %s836_s14  }
  0x2a   : > { %p1040_p13 = scmp.ne.s32.totalorder %s1038_s27, 0 }
  0x2b   : > { %p1041_p1 = scmp.eq.s32.totalorder (!%p1040_p13), %s889_s19, 0 }
  0x2c   : > { %189 = sbr.rel (%p1040_p13) target bundleno = 834 (0x342), region = 36 }
  0x33   : > { %811 = dma.done.wait (%p1041_p1), [#allocation3], 2048   ;;  %p1042_p0 = pmov %p1041_p1 }
  0x34   : > { %s952_s23 = sshll.u32 %s889_s19, 1  ;;  %v837_v0 = vmov 0.0   ;;  %vm838_vm0 = vmmov 0   ;;  %v707_v1 = vld [vmem:[%s1030_s1] sm:$0xff]   ;;  %v708_v2 = vld [vmem:[%s1030_s1 + $0x8] sm:$0xff]   ;;  %vm263_vm1 = vcmask 261120   ;;  %v350_v44 = vlaneseq }
  0x35   : > { %813 = vsyncadd (%p1042_p0), [#allocation3], 4294965248  ;;  %643 = vmatprep.subr.bf16.mxu0 %v837_v0  ;;  %647 = vmatprep.mubr.msk.bf16.mxu0 %vm838_vm0, %v837_v0  ;;  %p224_p5 = scmp.lt.s32.totalorder %s952_s23, 6  ;;  %v710_v8 = vld [vmem:[#allocation2 + $0x4] ss:$8 sps:$4 sm:$0xff]   ;;  %v839_v29 = vmov 0  }
  0x36   : > { %644 = vmatpush3.bf16.msra.mxu0 %v707_v1  ;;  %v712_v9 = vld [vmem:[#allocation2] ss:$8 sps:$4 sm:$0xff]   ;;  %v713_v10 = vld [vmem:[#allocation2 + $0x14] ss:$8 sps:$4 sm:$0xff]   ;;  %440 = vmatprep.subr.bf16.mxu1 %v710_v8  ;;  %v715_v11 = vld [vmem:[#allocation2 + $0x10] ss:$8 sps:$4 sm:$0xff]  }
  0x37   : > { %s225_s28 = scalar_select %p224_p5, %s952_s23, 6  ;;  %645 = vmatprep.subr.bf16.mxu0 %v837_v0  ;;  %441 = vmatpush1.bf16.msra.mxu1 %v712_v9  ;;  %v716_v12 = vld [vmem:[#allocation2 + $0x24] ss:$8 sps:$4 sm:$0xff]   ;;  %v718_v21 = vld [vmem:[#allocation2 + $0x20] ss:$8 sps:$4 sm:$0xff]   ;;  %v351_v45 = vshrl.u32 %v350_v44, 7 }
  0x38   : > { %442 = vmatprep.subr.bf16.mxu1 %v713_v10  ;;  %v719_v22 = vld [vmem:[#allocation2 + $0x34] ss:$8 sps:$4 sm:$0xff]   ;;  %v721_v23 = vld [vmem:[#allocation2 + $0x30] ss:$8 sps:$4 sm:$0xff]   ;;  %v722_v24 = vld [vmem:[#allocation2 + $0x44] ss:$8 sps:$4 sm:$0xff]   ;;  %472 = vmatprep.mubr.bf16.mxu1 %v839_v29 }
  0x39   : > { %s601_s29 = sshll.u32 %s225_s28, 2  ;;  %v724_v25 = vld [vmem:[#allocation2 + $0x40] ss:$8 sps:$4 sm:$0xff]   ;;  %v725_v26 = vld [vmem:[#allocation2 + $0x54] ss:$8 sps:$4 sm:$0xff]   ;;  %s216_s10 = sand.u32 1, %s824_s16  }
  0x3a   : > { %s227_s7 = scalar_lea.vmem %s1029_s0, %s601_s29  ;;  %646 = vmatpush3.bf16.msra.mxu0 %v708_v2  ;;  %v727_v27 = vld [vmem:[#allocation2 + $0x50] ss:$8 sps:$4 sm:$0xff]   ;;  %v728_v28 = vld [vmem:[#allocation2 + $0x64] ss:$8 sps:$4 sm:$0xff]   ;;  %v730_v30 = vld [vmem:[#allocation2 + $0x60] ss:$8 sps:$4 sm:$0xff]  }
  0x3b   : > { %v709_v3 = vld [vmem:[%s227_s7] sm:$0xff]   ;;  %443 = vmatpush1.bf16.msra.mxu1 %v715_v11  ;;  %v352_v46 = vsub.s32 0, %v351_v45  ;;  %v356_v48 = vsub.s32 1, %v351_v45  ;;  %s599_s13 = sshll.u32 %s216_s10, 4  ;;  %s969_s20 = scalar_lea.sflag [#allocation4], %s216_s10 }
  0x3c   : > { %444 = vmatprep.subr.bf16.mxu1 %v716_v12  ;;  %v731_v31 = vld [vmem:[#allocation2 + $0x74] ss:$8 sps:$4 sm:$0xff]   ;;  %v733_v32 = vld [vmem:[#allocation2 + $0x70] ss:$8 sps:$4 sm:$0xff]   ;;  %s218_s14 = scalar_lea.vmem [#allocation5], %s599_s13  ;;  %p1043_p6 = scmp.ne.s32.totalorder %s1036_s25, 0 }
  0x3d   : > { %648 = vmatmul.mubr.msk.bf16.vlgmr.msra.gmra.mrb[0].mxu0 %vm263_vm1, %v709_v3  ;;  %v348_v47 = vld [vmem:[%s1032_s3] sm:$0x3]  ;;  %s506_s22 = ssub.s32 (%p1043_p6), 7, %s952_s23 }
  0x3e   : > { %v353_v49 = vrot.slane %v348_v47, %v352_v46  ;;  %v357_v50 = vrot.slane %v348_v47, %v356_v48  ;;  %p507_p9 = scmp.lt.s32.totalorder (%p1043_p6), %s506_s22, 2 }
  0x3f   : > { %445 = vmatpush1.bf16.msra.mxu1 %v718_v21 }
  0x40   : > { %446 = vmatprep.subr.bf16.mxu1 %v719_v22 }
  0x43   : > { %447 = vmatpush1.bf16.msra.mxu1 %v721_v23 }
  0x44   : > { %448 = vmatprep.subr.bf16.mxu1 %v722_v24 }
  0x47   : > { %449 = vmatpush1.bf16.msra.mxu1 %v724_v25 }
  0x48   : > { %450 = vmatprep.subr.bf16.mxu1 %v725_v26 }
  0x4b   : > { %451 = vmatpush1.bf16.msra.mxu1 %v727_v27 }
  0x4c   : > { %452 = vmatprep.subr.bf16.mxu1 %v728_v28 }
  0x4f   : > { %453 = vmatpush1.bf16.msra.mxu1 %v730_v30 }
  0x50   : > { %454 = vmatprep.subr.bf16.mxu1 %v731_v31 }
  0x53   : > { %455 = vmatpush1.bf16.msra.mxu1 %v733_v32 }
 0x110   : > { %v301_v4 = vpop.f32.mrb[0].mxu0 }
 0x111   : > { %308 = vadd.xlane.f32.xlu0 %v301_v4  ;;  %v649_v5 = vpop.f32.mrb[1].mxu0 }
 0x112   : > { %v304_v6 = vpop.f32.mrb[2].mxu0 }
 0x113   : > { %v650_v7 = vpop.f32.mrb[3].mxu0 }
 0x115   : > { %310 = vadd.xlane.f32.xlu0 %v304_v6 }
 0x19e   : > { %v309_v13 = vpop.xlane.xlu0 %308 }
 0x19f   : > { %v313_v14 = vmul.f32 0.0078125, %v309_v13 }
 0x1a1   : > { %v315_v15 = vsub.f32 %v301_v4, %v313_v14 }
 0x1a2   : > { %v311_v16 = vpop.xlane.xlu0 %310 }
 0x1a3   : > { %v314_v17 = vmul.f32 0.0078125, %v311_v16  ;;  %v317_v18 = vmul.f32 %v315_v15, %v315_v15 }
 0x1a5   : > { %v316_v19 = vsub.f32 %v304_v6, %v314_v17  ;;  %319 = vadd.xlane.f32.xlu1 %v317_v18 }
 0x1a7   : > { %v318_v20 = vmul.f32 %v316_v19, %v316_v19 }
 0x1a9   : > { %321 = vadd.xlane.f32.xlu1 %v318_v20 }
 0x232   : > { %v320_v33 = vpop.xlane.xlu1 %319 }
 0x233   : > { %v323_v34 = vmul.f32 0.0078125, %v320_v33 }
 0x235   : > { %v325_v35 = vadd.f32 1e-05, %v323_v34 }
 0x236   : > { %v322_v36 = vpop.xlane.xlu1 %321 }
 0x237   : > { %v324_v37 = vmul.f32 0.0078125, %v322_v36  ;;  %734 = vrsqrt.f32 %v325_v35 }
 0x239   : > { %v326_v38 = vadd.f32 1e-05, %v324_v37 }
 0x23b   : > { %736 = vrsqrt.f32 %v326_v38 }
 0x241   : > { %v735_v39 = vpop.eup %734 }
 0x242   : > { %v329_v41 = vmul.f32 %v735_v39, %v315_v15 }
 0x245   : > { %v737_v40 = vpop.eup %736 }
 0x246   : > { %v330_v42 = vmul.f32 %v737_v40, %v316_v19 }
 0x248   : > { %v331_v43 = vpack.c.bf16 %v330_v42, %v329_v41 }
 0x24a   : > { %473 = vmatmul.mubr.bf16.vlgmr.msra.gmra.mrb[0].mxu1 %v331_v43 }
 0x31d   : > { %v474_v51 = vpop.f32.mrb[0].mxu1 }
 0x31e   : > { %v475_v52 = vadd.f32 %v474_v51, %v353_v49  ;;  %v476_v53 = vpop.f32.mrb[1].mxu1 }
 0x31f   : > { %v477_v54 = vadd.f32 %v476_v53, %v357_v50  ;;  %v478_v55 = vpop.f32.mrb[2].mxu1  ;;  %504 = sbr.rel (!%p1043_p6) target bundleno = 834 (0x342), region = 44 }
 0x320   : > { %v479_v56 = vadd.f32 %v478_v55, %v353_v49  ;;  %v480_v57 = vpop.f32.mrb[3].mxu1 }
 0x321   : > { %v635_v58 = vpack.c.bf16 %v477_v54, %v475_v52  ;;  %v481_v59 = vadd.f32 %v480_v57, %v357_v50 }
 0x323   : > { %495 = vst [vmem:[%s218_s14] sm:$0xff] %v635_v58  ;;  %v636_v60 = vpack.c.bf16 %v481_v59, %v479_v56 }
 0x325   : > { %496 = vst [vmem:[%s218_s14 + $0x8] sm:$0xff] %v636_v60 }
 0x326   : > { %s1050_s22 = smov (!%p507_p9, %s506_s22), 2 }
 0x327   : > { %s974_s28 = sshll.u32 %s1050_s22, 7 }
 0x328   : > { %s512_s29 = ssub.s32 256, %s974_s28 }
 0x329   : > { %513 = vsyncadd %s969_s20, %s512_s29  ;;  %p628_p10 = scmp.ne.s32.totalorder %s974_s28, 0  ;;  %s639_s27 = sshll.u32 %s889_s19, 8 }
 0x32a   : > { %s983_s25 = scalar_lea.hbm %s1033_s4, %s639_s27  ;;  %s519_s6 = sshll.u32 %s218_s14, 4  ;;  %s985_s6 = int_to_ptr.vmem [resolvable:$true] %s519_s6 }
 0x32b   : > { %s766_s23 = scalar_lea.vmem %s985_s6, %s974_s28  ;;  %s840_s7 = smov [#allocation5]  }
 0x32c   : > { %p767_p12 = scmp.ne.s32.totalorder %s985_s6, %s766_s23  ;;  %s770_s8 = sshll.u32 %s840_s7, 4  ;;  %s771_s8 = int_to_ptr.vmem [resolvable:$false] %s770_s8 }
 0x32d   : > { %s772_s19 = scalar_lea.vmem %s771_s8, 512  ;;  %p773_p4 = scmp.lt.s32.totalorder %s985_s6, %s771_s8 }
 0x32e   : > { %p768_p2 = pnand %p767_p12, %p628_p10  ;;  %p774_p7 = scmp.lt.s32.totalorder %s772_s19, %s766_s23 }
 0x330   : > { %p769_p3 = pneg %p768_p2  ;;  %p775_p8 = por %p774_p7, %p773_p4 }
 0x332   : > { %p776_p11 = pnand %p775_p8, %p769_p3 }
 0x334   : > { %779 = shalt.err (!%p776_p11)
}
 0x335   : > { %s780_s9 = scalar_lea.hbm %s983_s25, %s974_s28  ;;  %s784_s12 = scalar_lea.hbm %s1033_s4, 896 }
 0x336   : > { %p781_p13 = scmp.ne.s32.totalorder %s983_s25, %s780_s9  ;;  %p785_p5 = scmp.lt.u32.totalorder %s983_s25, %s1033_s4 }
 0x337   : > { %p786_p6 = scmp.lt.u32.totalorder %s784_s12, %s780_s9  ;;  %p788_p12 = scmp.lt.u32.totalorder %s780_s9, %s983_s25 }
 0x338   : > { %p782_p1 = pnand %p781_p13, %p628_p10 }
 0x339   : > { %p787_p9 = por %p786_p6, %p785_p5 }
 0x33a   : > { %p783_p0 = pneg %p782_p1 }
 0x33b   : > { %p789_p2 = por %p788_p12, %p787_p9 }
 0x33d   : > { %p790_p3 = pnand %p789_p2, %p783_p0 }
 0x33f   : > { %793 = shalt.err (!%p790_p3)
}
 0x340   : > { %s841_s22 = smov 128   ;;  %s842_s29 = smov 8  }
 0x341   : > { %525 = dma.vmem_to_hbm [thread:$0]  (%p628_p10), %s985_s6, %s974_s28, %s983_s25, %s969_s20, %s841_s22, %s841_s22, %s842_s29  }
 0x342 PF: > { %p666_p4 = scmp.ge.s32.totalorder %s832_s18, 2  ;;  %s534_s27 = sand.u32 1, %s820_s15  }
 0x343   : > { %p1044_p7 = scmp.ne.s32.totalorder %s1037_s26, 0  ;;  %s535_s30 = scalar_lea.sflag [#allocation4], %s534_s27 }
 0x345   : > { %p661_p8 = pnand %p666_p4, %p1044_p7 }
 0x347   : > { %815 = dma.done.wait (!%p661_p8), %s535_s30, 256  }
 0x348   : > { %817 = vsyncadd (!%p661_p8), %s535_s30, 4294967040  ;;  %p15_p11 = scmp.ge.s32.totalorder %s893_s21, 6   ;;  %s1045_s15 = smov %s824_s16 }
 0x349   : > { %s1046_s16 = smov %s828_s17  ;;  %s1047_s17 = smov %s904_s24 }
 0x34a   : > { %s1048_s18 = smov %s893_s21  ;;  %17 = sbr.rel (!%p15_p11) target bundleno = 4 (0x4), region = 76 }
 0x351   :  { %540 = vsyncpa [#allocation3], 1 }
 0x352   :  { %542 = vsyncpa [#allocation3 + $0x1], 1 }
 0x353   :  { %543 = vsyncpa [#allocation4], 1 }
 0x354   :  { %545 = vsyncpa [#allocation4 + $0x1], 1 }

</bundles_post_ra>
